<compile_context>
chip_gen: v6e
topology: v6e:2x2x1
jax: 0.10.0
libtpu: 0.0.40
codegen_flags: <defaults>
</compile_context>

<pallas_src>
import jax
import jax.numpy as jnp
from jax.experimental import pallas as pl
from jax.experimental.pallas import tpu as pltpu

KERNEL = 3        # local-filter kernel size (k)
FILTERS = 32      # FilterNet hidden width


# ---------------------------------------------------------------------------
# One-time probe: pin down pltpu.roll's direction convention on this backend.
# ---------------------------------------------------------------------------
_ROLL_MATCHES_JNP = None


def _roll_matches_jnp_roll():
    """Tiny 1-vreg probe so the in-kernel shifts are direction-proof."""
    global _ROLL_MATCHES_JNP
    if _ROLL_MATCHES_JNP is None:
        def probe(x_ref, o_ref):
            o_ref[...] = pltpu.roll(x_ref[...], 1, 1)

        with jax.ensure_compile_time_eval():
            x = jax.lax.broadcasted_iota(jnp.float32, (8, 128), 1)
            y = pl.pallas_call(
                probe,
                out_shape=jax.ShapeDtypeStruct((8, 128), jnp.float32))(x)
            # jnp.roll(x, 1, axis=1)[0, 0] == 127
            _ROLL_MATCHES_JNP = bool(y[0, 0] == 127.0)
    return _ROLL_MATCHES_JNP


# ---------------------------------------------------------------------------
# Fused Pallas kernel (whole FilterNet + Local_Filter_Operation fuse stage)
# ---------------------------------------------------------------------------
def _build_fusion_kernel(H, W, roll_like_jnp):
    HW = H * W
    K2 = KERNEL * KERNEL

    def kernel(xunf_ref,
               wi_ref, pi_ref, w1_ref, p1_ref, w2_ref, p2_ref, w3_ref, p3_ref,
               w4_ref, p4_ref, w5_ref, p5_ref, wk_ref, pk_ref,
               o_ref):
        # --- tap geometry: shift amounts + zero-pad validity masks (hoisted) ---
        pix = jax.lax.broadcasted_iota(jnp.int32, (1, HW), 1)
        hh = pix // W
        ww = pix % W
        fmasks, shifts = [], []
        for di in range(KERNEL):
            for dj in range(KERNEL):
                sh, sw = di - 1, dj - 1
                valid = ((hh + sh >= 0) & (hh + sh < H) &
                         (ww + sw >= 0) & (ww + sw < W))
                fmasks.append(valid.astype(jnp.float32))
                shifts.append(sh * W + sw)

        def taps(a):
            """(Cin, HW) -> (9*Cin, HW) im2col taps; row = tap*Cin + cin."""
            parts = []
            for t in range(K2):
                s = shifts[t]
                if s == 0:
                    sa = a
                else:
                    amt = (-s) % HW if roll_like_jnp else s % HW
                    sa = pltpu.roll(a, amt, 1)      # sa[:, p] == a[:, p + s]
                parts.append(sa * fmasks[t])        # zero outside the image
            return jnp.concatenate(parts, axis=0)

        def conv(tp, w_ref, p_ref):
            """conv3x3 as one big-K bf16 MXU matmul + folded BN + PReLU (f32)."""
            y = jnp.dot(w_ref[...], tp.astype(jnp.bfloat16),
                        preferred_element_type=jnp.float32)      # (Cout, HW)
            p = p_ref[...]                                        # (Cout, 3)
            scale, shift, alpha = p[:, 0:1], p[:, 1:2], p[:, 2:3]
            y = y * scale + shift
            return jnp.where(y > 0.0, y, alpha * y)               # PReLU

        # Channel-major unfold of the input: serves both as the init layer's
        # im2col taps and as Local_Filter_Operation's Reshape'd input.
        x_unf = xunf_ref[0]                                       # (C*9, HW) f32

        init = conv(x_unf, wi_ref, pi_ref)                        # (32, HW)
        c01 = conv(taps(init), w1_ref, p1_ref)
        c02 = conv(taps(c01), w2_ref, p2_ref)
        c03 = conv(taps(c02), w3_ref, p3_ref)
        c04 = conv(taps(jnp.concatenate([c02, c03], axis=0)), w4_ref, p4_ref)
        c05 = conv(taps(jnp.concatenate([c01, c04], axis=0)), w5_ref, p5_ref)
        logits = conv(taps(jnp.concatenate([init, c05], axis=0)),
                      wk_ref, pk_ref)                             # (C*9, HW)

        # softmax over the C*k*k axis, multiply by unfolded input, sum.
        m = jnp.max(logits, axis=0, keepdims=True)
        e = jnp.exp(logits - m)
        denom = jnp.sum(e, axis=0, keepdims=True)
        prob = e * pl.reciprocal(denom, approx=True)
        o_ref[0] = jnp.sum(prob * x_unf, axis=0, keepdims=True)   # (1, HW)

    return kernel


# ---------------------------------------------------------------------------
# Plain-JAX glue (tiny: only the input unfold) + unfold helpers
# ---------------------------------------------------------------------------
def _unfold_cmaj(x):
    """(B,C,H,W) -> (B, C*9, H*W); row n = c*9 + (3*di+dj). Matches
    Local_Filter_Operation.Reshape's channel ordering (zero pad=1)."""
    B, C, H, W = x.shape
    xp = jnp.pad(x, ((0, 0), (0, 0), (1, 1), (1, 1)))
    t = jnp.stack([xp[:, :, i:i + H, j:j + W]
                   for i in range(KERNEL) for j in range(KERNEL)], axis=2)
    return t.reshape(B, C * KERNEL * KERNEL, H * W)


def _unfold_tmaj(x):
    """(B,C,H,W) -> (B, 9*C, H*W); row = (3*di+dj)*C + c (tap-major)."""
    B, C, H, W = x.shape
    xp = jnp.pad(x, ((0, 0), (0, 0), (1, 1), (1, 1)))
    t = jnp.stack([xp[:, :, i:i + H, j:j + W]
                   for i in range(KERNEL) for j in range(KERNEL)], axis=1)
    return t.reshape(B, KERNEL * KERNEL * C, H * W)


# ---------------------------------------------------------------------------
# Deterministic parameter init (shapes follow the PyTorch module's __init__)
# ---------------------------------------------------------------------------
def _make_layer(key, cin, cout, bn_prelu=True, channel_major=False):
    """Returns (W, P): W (Cout, 9*Cin) bf16 matmul weights; P (Cout, 3) f32
    with columns [scale, shift, alpha] (BatchNorm + conv-bias folded)."""
    kw, kb = jax.random.split(key)
    if channel_major:   # columns ordered cin*9 + tap (matches _unfold_cmaj rows)
        w = jax.random.normal(kw, (cout, cin, KERNEL * KERNEL), jnp.float32)
    else:               # columns ordered tap*cin + cin (matches in-kernel taps)
        w = jax.random.normal(kw, (cout, KERNEL * KERNEL, cin), jnp.float32)
    w = (w / jnp.sqrt(9.0 * cin)).reshape(cout, KERNEL * KERNEL * cin)
    w = w.astype(jnp.bfloat16)
    bias = 0.01 * jax.random.normal(kb, (cout,), jnp.float32)
    if bn_prelu:
        # TODO(synk): BatchNorm2d is folded in inference mode with PyTorch-default
        # affine/running stats (gamma=1, beta=0, mean=0, var=1); training-mode
        # batch statistics are not reproduced.
        gamma = jnp.ones((cout,), jnp.float32)
        beta = jnp.zeros((cout,), jnp.float32)
        mean = jnp.zeros((cout,), jnp.float32)
        var = jnp.ones((cout,), jnp.float32)
        eps = 1e-5
        scale = gamma / jnp.sqrt(var + eps)
        shift = beta + scale * (bias - mean)
        # TODO(synk): torch.nn.PReLU() default is one shared alpha; per-channel
        # alpha with the same 0.25 init is used here.
        alpha = jnp.full((cout,), 0.25, jnp.float32)
    else:
        scale = jnp.ones((cout,), jnp.float32)
        shift = bias
        alpha = jnp.ones((cout,), jnp.float32)   # identity activation
    return w, jnp.stack([scale, shift, alpha], axis=1)


def init_fusion_net_params(key, channels=2):
    keys = jax.random.split(key, 7)
    f = FILTERS
    return {
        "init":   _make_layer(keys[0], channels, f, channel_major=True),
        "conv01": _make_layer(keys[1], f, f),
        "conv02": _make_layer(keys[2], f, f),
        "conv03": _make_layer(keys[3], f, f),
        "conv04": _make_layer(keys[4], 2 * f, f),
        "conv05": _make_layer(keys[5], 2 * f, f),
        "out_k":  _make_layer(keys[6], 2 * f, channels * KERNEL * KERNEL,
                              bn_prelu=False),
    }


_LAYER_ORDER = ("init", "conv01", "conv02", "conv03", "conv04", "conv05", "out_k")


# ---------------------------------------------------------------------------
# Fusion_Net forward (single fused pallas_call)
# ---------------------------------------------------------------------------
def fusion_net_forward(params, x1, x2):
    """x1, x2: NCHW (B, 1, H, W) -> (B, 1, H, W), like the PyTorch Fusion_Net."""
    x = jnp.concatenate([x1, x2], axis=1).astype(jnp.float32)    # (B, 2, H, W)
    B, C, H, W = x.shape
    HW = H * W
    x_unf = _unfold_cmaj(x)                                      # (B, C*9, HW)

    flat = []
    for name in _LAYER_ORDER:
        w, p = params[name]
        flat += [w, p]

    kernel = _build_fusion_kernel(H, W, _roll_matches_jnp_roll())
    out = pl.pallas_call(
        kernel,
        out_shape=jax.ShapeDtypeStruct((B, 1, HW), jnp.float32),
        grid_spec=pltpu.PrefetchScalarGridSpec(
            num_scalar_prefetch=0,
            grid=(B,),
            in_specs=[pl.BlockSpec((1, C * KERNEL * KERNEL, HW),
                                   lambda b: (b, 0, 0))]
                     + [pl.BlockSpec(t.shape, lambda b: (0, 0)) for t in flat],
            out_specs=pl.BlockSpec((1, 1, HW), lambda b: (b, 0, 0)),
        ),
        compiler_params=pltpu.CompilerParams(
            dimension_semantics=("parallel",)),
    )(x_unf, *flat)
    return out.reshape(B, 1, H, W)


# ---------------------------------------------------------------------------
# Pure-jnp reference (same folded-BN / bf16-matmul numerics) for validation
# ---------------------------------------------------------------------------
def _ref_conv(a, w, p, unfold):
    B, _, H, W = a.shape
    t = unfold(a).astype(jnp.bfloat16)                           # (B, K, HW)
    y = jnp.einsum("ok,bkp->bop", w, t,
                   preferred_element_type=jnp.float32)           # (B, Cout, HW)
    scale = p[:, 0][None, :, None]
    shift = p[:, 1][None, :, None]
    alpha = p[:, 2][None, :, None]
    y = y * scale + shift
    y = jnp.where(y > 0.0, y, alpha * y)
    return y.reshape(B, -1, H, W)


def fusion_net_reference(params, x1, x2):
    x = jnp.concatenate([x1, x2], axis=1).astype(jnp.float32)
    B, C, H, W = x.shape
    init = _ref_conv(x, *params["init"], _unfold_cmaj)
    c01 = _ref_conv(init, *params["conv01"], _unfold_tmaj)
    c02 = _ref_conv(c01, *params["conv02"], _unfold_tmaj)
    c03 = _ref_conv(c02, *params["conv03"], _unfold_tmaj)
    c04 = _ref_conv(jnp.concatenate([c02, c03], axis=1),
                    *params["conv04"], _unfold_tmaj)
    c05 = _ref_conv(jnp.concatenate([c01, c04], axis=1),
                    *params["conv05"], _unfold_tmaj)
    logits = _ref_conv(jnp.concatenate([init, c05], axis=1),
                       *params["out_k"], _unfold_tmaj)
    prob = jax.nn.softmax(logits.reshape(B, C * KERNEL * KERNEL, H * W), axis=1)
    xr = _unfold_cmaj(x)
    return jnp.sum(prob * xr, axis=1).reshape(B, 1, H, W)


if __name__ == "__main__":
    key = jax.random.PRNGKey(0)
    k1, k2, kp = jax.random.split(key, 3)
    B, H, W = 2, 16, 16
    x1 = jax.random.normal(k1, (B, 1, H, W), jnp.float32)
    x2 = jax.random.normal(k2, (B, 1, H, W), jnp.float32)
    params = init_fusion_net_params(kp, channels=2)

    _roll_matches_jnp_roll()          # run the tiny direction probe before jit

    out = jax.jit(fusion_net_forward)(params, x1, x2)
    out = jax.block_until_ready(out)
    assert out.shape == (B, 1, H, W), out.shape
    assert bool(jnp.all(jnp.isfinite(out)))

    ref = fusion_net_reference(params, x1, x2)
    max_diff = float(jnp.max(jnp.abs(out - ref)))
    assert max_diff < 2e-2, f"kernel vs reference mismatch: {max_diff}"
    print("KERNEL_OK")
</pallas_src>

<mosaic_0001>
module attributes {stable_mosaic.version = 11 : i64} {
  func.func @probe(%arg0: memref<8x128xf32, #tpu.memory_space<vmem>>, %arg1: memref<8x128xf32, #tpu.memory_space<vmem>>) attributes {dimension_semantics = [], scalar_prefetch = 0 : i64, scratch_operands = 0 : i64, tpu.core_type = #tpu.core_type<tc>} {
    %c0 = arith.constant 0 : index
    %c0_0 = arith.constant 0 : index
    %0 = vector.load %arg0[%c0, %c0_0] : memref<8x128xf32, #tpu.memory_space<vmem>>, vector<8x128xf32>
    %c1_i32 = arith.constant 1 : i32
    %1 = tpu.dynamic_rotate %0 by %c1_i32 dim 1 : vector<8x128xf32>, i32 -> vector<8x128xf32>
    %c0_1 = arith.constant 0 : index
    %c0_2 = arith.constant 0 : index
    %2 = vector.load %arg1[%c0_1, %c0_2] : memref<8x128xf32, #tpu.memory_space<vmem>>, vector<8x128xf32>
    tpu.vector_store %arg1[%c0_1, %c0_2], %1 {strides = array<i32>} : memref<8x128xf32, #tpu.memory_space<vmem>>, vector<8x128xf32>,
    return
  }
}

</mosaic_0001>

<bundles_post_ra>
// kernel: tpu_custom_call.1
= control target key start
LH: loop header
LB: loop body
LE: loop exit
PB: predicated region body
PF: predicated region fallthrough
CT: control target
= control target key end

     0   :  { %6 = vsyncpa [#allocation3], 0  ;;  %s106_s0 = inlined_call_operand.hbm [shape: f32[8,128], index: 0, kind: input, shape index: {}]   ;;  %s107_s1 = inlined_call_operand.hbm [shape: f32[8,128], index: 1, kind: output, shape index: {}]  }
   0x1   :  { %7 = vsyncpa [#allocation4], 0  ;;  %s87_s6 = smov [#allocation2]  }
   0x2   :  { %s14_s7 = sshll.u32 %s87_s6, 4  ;;  %s15_s7 = int_to_ptr.vmem [resolvable:$true] %s14_s7 }
   0x3   :  { %s51_s8 = scalar_lea.vmem %s15_s7, 128  ;;  %p56_p1 = scmp.lt.s32.totalorder %s15_s7, %s15_s7 }
   0x4   :  { %p52_p0 = scmp.ne.s32.totalorder %s15_s7, %s51_s8  ;;  %p57_p2 = scmp.lt.s32.totalorder %s51_s8, %s51_s8 }
   0x6   :  { %p58_p3 = por %p57_p2, %p56_p1 }
   0x8   :  { %p59_p4 = pnand %p58_p3, %p52_p0 }
   0xa   :  { %62 = shalt.err (!%p59_p4)
}
   0xb   :  { %17 = dma.hbm_to_vmem [thread:$0]  %s106_s0, 128, %s15_s7, [#allocation3]  }
   0xc   :  { %83 = dma.done.wait [#allocation3], 128  }
   0xd   :  { %84 = vsyncadd [#allocation3], 4294967168  ;;  %v21_v0 = vld [vmem:[#allocation2] sm:$0xff]  ;;  %s88_s11 = smov 1   ;;  %s89_s12 = smov [#allocation5]  }
   0xe   :  { %22 = vrot.lane.b32.xlu0 %v21_v0, %s88_s11  ;;  %s31_s13 = sshll.u32 %s89_s12, 4  ;;  %s32_s13 = int_to_ptr.vmem [resolvable:$true] %s31_s13 }
   0xf   :  { %s63_s14 = scalar_lea.vmem %s32_s13, 128  ;;  %p68_p6 = scmp.lt.s32.totalorder %s32_s13, %s32_s13 }
  0x10   :  { %p64_p5 = scmp.ne.s32.totalorder %s32_s13, %s63_s14  ;;  %p69_p7 = scmp.lt.s32.totalorder %s63_s14, %s63_s14 }
  0x12   :  { %p70_p8 = por %p69_p7, %p68_p6 }
  0x14   :  { %p71_p9 = pnand %p70_p8, %p64_p5 }
  0x80   :  { %v23_v1 = vpop.permute.xlu0 %22 }
  0x81   :  { %24 = vst [vmem:[#allocation5] sm:$0xff] %v23_v1 }
  0x82   :  { %74 = shalt.err (!%p71_p9)
}
  0x83   :  { %34 = dma.vmem_to_hbm [thread:$0]  %s32_s13, 128, %s107_s1, [#allocation4]  }
  0x84   :  { %85 = dma.done.wait [#allocation4], 128  }
  0x85   :  { %86 = vsyncadd [#allocation4], 4294967168 }
  0x86   :  { %38 = vsyncpa [#allocation3], 1 }
  0x87   :  { %39 = vsyncpa [#allocation4], 1 }

</bundles_post_ra>
